<compile_context>
chip_gen: v5e
topology: v5e:2x2
jax: 0.10.0
libtpu: 0.0.40
codegen_flags: <defaults>
</compile_context>

<pallas_src>
import functools

import jax
import jax.numpy as jnp
from jax.experimental import pallas as pl
from jax.experimental.pallas import tpu as pltpu

CATEGORY_NUM = 8     # CATEGORY_NUM is undefined in the source; pick a small value
HIDDEN_SIZE = 32     # stand-in for AutoConfig(...).hidden_size
MID = 64             # width of fc1/fc2 as in the module
BN_EPS = 1e-5        # PyTorch BatchNorm1d default eps

MID_PAD = 128        # lane-dense padding of the 64-wide hidden layers
CAT_PAD = 128        # lane-dense padding of the output
BN_ROWS = 8          # BN scale/bias packed into one (8, 128) sublane tile

# Row offsets inside the packed parameter slab.
_W1_OFF = 0
_W2_OFF = _W1_OFF + HIDDEN_SIZE
_W3_OFF = _W2_OFF + MID_PAD
_BN_OFF = _W3_OFF + MID_PAD
_PARAM_ROWS = _BN_OFF + BN_ROWS           # 32 + 128 + 128 + 8 = 296 (multiple of 8)


def basev2_head_kernel(embed_ref, params_ref, out_ref):
    """One batch tile of the head. params slab is resident across the grid."""
    # Static slices of the packed parameter slab (all lane-dense, 128 wide).
    w1 = params_ref[_W1_OFF:_W2_OFF, :]            # [HIDDEN_SIZE, 128]
    w2 = params_ref[_W2_OFF:_W3_OFF, :]            # [128, 128]
    w3 = params_ref[_W3_OFF:_BN_OFF, :]            # [128, 128]
    bn = params_ref[_BN_OFF:_PARAM_ROWS, :]        # [8, 128]; row0=scale, row1=bias
    scale = bn[0:1, :].astype(jnp.float32)
    bias = bn[1:2, :].astype(jnp.float32)

    embed = embed_ref[...]

    # fc1 (no bias) + ReLU  -> MXU matmul (f32 accumulation) + VPU max.
    h1 = jnp.maximum(
        jnp.dot(embed, w1, preferred_element_type=jnp.float32), 0.0)

    # BatchNorm1d(64) eval mode, pre-folded on host: b1 = h1 * scale + bias.
    # Padded lanes (64..127) of scale/bias are zero, so b1 stays zero there.
    b1 = h1 * scale + bias

    # Dropout(0.4) is identity in eval mode; fc2 + ReLU + residual b1.
    h2 = jnp.maximum(
        jnp.dot(h1.astype(w2.dtype), w2, preferred_element_type=jnp.float32),
        0.0) + b1

    # Dropout(0.2) is identity in eval mode; fc3 (no bias), lane-dense output.
    out_ref[...] = jnp.dot(
        h2.astype(w3.dtype), w3,
        preferred_element_type=jnp.float32).astype(out_ref.dtype)


def _pack_params(w1, w2, w3, gamma, beta, mean, var, dtype):
    """Fold BN and pack all head parameters into one [_PARAM_ROWS, 128] slab."""
    gamma = jnp.asarray(gamma, jnp.float32).reshape(-1)
    beta = jnp.asarray(beta, jnp.float32).reshape(-1)
    mean = jnp.asarray(mean, jnp.float32).reshape(-1)
    var = jnp.asarray(var, jnp.float32).reshape(-1)

    scale = gamma * jax.lax.rsqrt(var + BN_EPS)          # [MID]
    bias = beta - mean * scale                           # [MID]

    w1p = jnp.zeros((HIDDEN_SIZE, MID_PAD), jnp.float32).at[:, :MID].set(w1)
    w2p = jnp.zeros((MID_PAD, MID_PAD), jnp.float32).at[:MID, :MID].set(w2)
    w3p = jnp.zeros((MID_PAD, CAT_PAD), jnp.float32).at[:MID, :CATEGORY_NUM].set(w3)
    bnp = (jnp.zeros((BN_ROWS, MID_PAD), jnp.float32)
           .at[0, :MID].set(scale)
           .at[1, :MID].set(bias))

    slab = jnp.concatenate([w1p, w2p, w3p, bnp], axis=0)  # [_PARAM_ROWS, 128]
    return slab.astype(dtype)


@functools.partial(jax.jit, static_argnames=("block_batch", "compute_dtype"))
def basev2_head(embed, w1, w2, w3, gamma, beta, mean, var,
                *, block_batch=256, compute_dtype=jnp.float32):
    batch = embed.shape[0]

    params = _pack_params(w1, w2, w3, gamma, beta, mean, var, compute_dtype)
    embed = embed.astype(compute_dtype)

    # Batch tile: multiple of 8 (sublane), capped by block_batch.
    block_batch = max(8, (block_batch // 8) * 8)
    if batch >= block_batch:
        tb = block_batch
    else:
        tb = ((batch + 7) // 8) * 8
    padded_batch = ((batch + tb - 1) // tb) * tb
    if padded_batch != batch:
        embed = jnp.pad(embed, ((0, padded_batch - batch), (0, 0)))

    grid = (pl.cdiv(padded_batch, tb),)

    out_padded = pl.pallas_call(
        basev2_head_kernel,
        out_shape=jax.ShapeDtypeStruct((padded_batch, CAT_PAD), jnp.float32),
        grid=grid,
        in_specs=[
            # Batch tile of embeddings; pipelined across the grid.
            pl.BlockSpec((tb, HIDDEN_SIZE), lambda i: (i, 0)),
            # Packed parameter slab; block index constant -> resident in VMEM.
            pl.BlockSpec((_PARAM_ROWS, MID_PAD), lambda i: (0, 0)),
        ],
        out_specs=pl.BlockSpec((tb, CAT_PAD), lambda i: (i, 0)),
        compiler_params=pltpu.CompilerParams(
            dimension_semantics=("parallel",),   # v7x: shard batch over 2 TCs
        ),
    )(embed, params)

    # Strip batch padding and the lane padding of the output.
    return out_padded[:batch, :CATEGORY_NUM]


def reference_head(embed, w1, w2, w3, gamma, beta, mean, var):
    h1 = jnp.maximum(embed @ w1, 0.0)
    b1 = (h1 - mean) / jnp.sqrt(var + BN_EPS) * gamma + beta
    h2 = jnp.maximum(h1 @ w2, 0.0) + b1
    return h2 @ w3


if __name__ == "__main__":
    key = jax.random.PRNGKey(0)
    k_embed, k_w1, k_w2, k_w3, k_g, k_b, k_m, k_v, k_big = jax.random.split(key, 9)

    # Deterministic synthetic parameters (shapes follow the module __init__,
    # linear weights stored as [in_features, out_features]).
    w1 = jax.random.normal(k_w1, (HIDDEN_SIZE, MID), dtype=jnp.float32) * 0.1
    w2 = jax.random.normal(k_w2, (MID, MID), dtype=jnp.float32) * 0.1
    w3 = jax.random.normal(k_w3, (MID, CATEGORY_NUM), dtype=jnp.float32) * 0.1

    gamma = 1.0 + 0.1 * jax.random.normal(k_g, (MID,), dtype=jnp.float32)
    beta = 0.1 * jax.random.normal(k_b, (MID,), dtype=jnp.float32)
    running_mean = 0.1 * jax.random.normal(k_m, (MID,), dtype=jnp.float32)
    running_var = jax.random.uniform(k_v, (MID,), dtype=jnp.float32,
                                     minval=0.5, maxval=1.5)

    # --- small benchmark-sized batch (single grid point) ---
    batch = 8
    embed = jax.random.normal(k_embed, (batch, HIDDEN_SIZE), dtype=jnp.float32)

    out = basev2_head(embed, w1, w2, w3, gamma, beta,
                      running_mean, running_var)
    out = jax.block_until_ready(out)
    ref = reference_head(embed, w1, w2, w3, gamma, beta,
                         running_mean, running_var)
    assert out.shape == (batch, CATEGORY_NUM)
    assert jnp.allclose(out, ref, atol=1e-4, rtol=1e-4), "mismatch (batch=8)"

    # --- larger ragged batch exercising the batch grid + tail padding ---
    big_batch = 300
    embed_big = jax.random.normal(k_big, (big_batch, HIDDEN_SIZE), dtype=jnp.float32)
    out_big = basev2_head(embed_big, w1, w2, w3, gamma, beta,
                          running_mean, running_var, block_batch=128)
    out_big = jax.block_until_ready(out_big)
    ref_big = reference_head(embed_big, w1, w2, w3, gamma, beta,
                             running_mean, running_var)
    assert out_big.shape == (big_batch, CATEGORY_NUM)
    assert jnp.allclose(out_big, ref_big, atol=1e-4, rtol=1e-4), "mismatch (batch=300)"

    print("KERNEL_OK")
</pallas_src>

<mosaic_0001>
module attributes {stable_mosaic.version = 11 : i64} {
  func.func @basev2_head_kernel(%arg0: i32, %arg1: memref<8x32xf32, #tpu.memory_space<vmem>>, %arg2: memref<296x128xf32, #tpu.memory_space<vmem>>, %arg3: memref<8x128xf32, #tpu.memory_space<vmem>>) attributes {dimension_semantics = [#tpu.dimension_semantics<parallel>], iteration_bounds = array<i64: 1>, scalar_prefetch = 0 : i64, scratch_operands = 0 : i64, tpu.core_type = #tpu.core_type<tc>, window_params = [{transform_indices = @transform_0, window_bounds = array<i64: 8, 32>}, {pipeline_mode = #tpu.pipeline_mode<synchronous>, transform_indices = @transform_1, window_bounds = array<i64: 296, 128>}, {transform_indices = @transform_2, window_bounds = array<i64: 8, 128>}]} {
    %c0 = arith.constant 0 : index
    %c0_0 = arith.constant 0 : index
    %0 = vector.load %arg2[%c0, %c0_0] : memref<296x128xf32, #tpu.memory_space<vmem>>, vector<32x128xf32>
    %c32 = arith.constant 32 : index
    %c0_1 = arith.constant 0 : index
    %1 = vector.load %arg2[%c32, %c0_1] : memref<296x128xf32, #tpu.memory_space<vmem>>, vector<128x128xf32>
    %c160 = arith.constant 160 : index
    %c0_2 = arith.constant 0 : index
    %2 = vector.load %arg2[%c160, %c0_2] : memref<296x128xf32, #tpu.memory_space<vmem>>, vector<128x128xf32>
    %c288 = arith.constant 288 : index
    %c0_3 = arith.constant 0 : index
    %3 = vector.load %arg2[%c288, %c0_3] : memref<296x128xf32, #tpu.memory_space<vmem>>, vector<8x128xf32>
    %4 = vector.extract_strided_slice %3 {offsets = [0, 0], sizes = [1, 128], strides = [1, 1]} : vector<8x128xf32> to vector<1x128xf32>
    %5 = vector.extract_strided_slice %3 {offsets = [1, 0], sizes = [1, 128], strides = [1, 1]} : vector<8x128xf32> to vector<1x128xf32>
    %c0_4 = arith.constant 0 : index
    %c0_5 = arith.constant 0 : index
    %6 = vector.load %arg1[%c0_4, %c0_5] : memref<8x32xf32, #tpu.memory_space<vmem>>, vector<8x32xf32>
    %cst = arith.constant dense<0.000000e+00> : vector<8x128xf32>
    %7 = tpu.matmul %6, %0, %cst {dimension_numbers = #tpu.dot_dimension_numbers<[1], [0], [0], [1], [0, 0, 1, 1], [], []>} : vector<8x32xf32>, vector<32x128xf32>, vector<8x128xf32> -> vector<8x128xf32>
    %cst_6 = arith.constant 0.000000e+00 : f32
    %8 = vector.broadcast %cst_6 : f32 to vector<8x128xf32>
    %9 = arith.maximumf %7, %8 : vector<8x128xf32>
    %10 = vector.broadcast %4 : vector<1x128xf32> to vector<8x128xf32>
    %11 = arith.mulf %9, %10 : vector<8x128xf32>
    %12 = vector.broadcast %5 : vector<1x128xf32> to vector<8x128xf32>
    %13 = arith.addf %11, %12 : vector<8x128xf32>
    %cst_7 = arith.constant dense<0.000000e+00> : vector<8x128xf32>
    %14 = tpu.matmul %9, %1, %cst_7 {dimension_numbers = #tpu.dot_dimension_numbers<[1], [0], [0], [1], [0, 0, 1, 1], [], []>} : vector<8x128xf32>, vector<128x128xf32>, vector<8x128xf32> -> vector<8x128xf32>
    %cst_8 = arith.constant 0.000000e+00 : f32
    %15 = vector.broadcast %cst_8 : f32 to vector<8x128xf32>
    %16 = arith.maximumf %14, %15 : vector<8x128xf32>
    %17 = arith.addf %16, %13 : vector<8x128xf32>
    %cst_9 = arith.constant dense<0.000000e+00> : vector<8x128xf32>
    %18 = tpu.matmul %17, %2, %cst_9 {dimension_numbers = #tpu.dot_dimension_numbers<[1], [0], [0], [1], [0, 0, 1, 1], [], []>} : vector<8x128xf32>, vector<128x128xf32>, vector<8x128xf32> -> vector<8x128xf32>
    %c0_10 = arith.constant 0 : index
    %c0_11 = arith.constant 0 : index
    %19 = vector.load %arg3[%c0_10, %c0_11] : memref<8x128xf32, #tpu.memory_space<vmem>>, vector<8x128xf32>
    tpu.vector_store %arg3[%c0_10, %c0_11], %18 {strides = array<i32>} : memref<8x128xf32, #tpu.memory_space<vmem>>, vector<8x128xf32>,
    return
  }
  func.func @transform_0(%arg0: i32) -> (i32, i32) {
    %c0_i32 = arith.constant 0 : i32
    %c0_i32_0 = arith.constant 0 : i32
    return %arg0, %c0_i32 : i32, i32
  }
  func.func @transform_1(%arg0: i32) -> (i32, i32) {
    %c0_i32 = arith.constant 0 : i32
    %c0_i32_0 = arith.constant 0 : i32
    %c0_i32_1 = arith.constant 0 : i32
    return %c0_i32, %c0_i32_0 : i32, i32
  }
  func.func @transform_2(%arg0: i32) -> (i32, i32) {
    %c0_i32 = arith.constant 0 : i32
    %c0_i32_0 = arith.constant 0 : i32
    return %arg0, %c0_i32 : i32, i32
  }
}

</mosaic_0001>

<bundles_post_ra>
// kernel: basev2_head.1
= control target key start
LH: loop header
LB: loop body
LE: loop exit
PB: predicated region body
PF: predicated region fallthrough
CT: control target
= control target key end

     0   :  { %vm50_vm0 = vcmask 261120   ;;  %s299_s0 = inlined_call_operand.vmem [shape: f32[8,32], index: 0, kind: input, shape index: {}]   ;;  %s300_s1 = inlined_call_operand.vmem [shape: f32[296,128], index: 1, kind: input, shape index: {}]   ;;  %s301_s2 = inlined_call_operand.hbm [shape: f32[8,128], index: 2, kind: output, shape index: {}]  }
   0x1   :  { %v15_v0 = vld [vmem:[%s300_s1 + $0x18] sm:$0xff]  ;;  %v14_v1 = vld [vmem:[%s300_s1 + $0x10] sm:$0xff]  ;;  %v13_v3 = vld [vmem:[%s300_s1 + $0x8] sm:$0xff] }
   0x2   :  { %66 = vmatpush.msra.mxu0 %v15_v0  ;;  %v31_v2 = vld [vmem:[%s300_s1 + $0x98] sm:$0xff]  ;;  %v30_v4 = vld [vmem:[%s300_s1 + $0x90] sm:$0xff]  ;;  %v29_v5 = vld [vmem:[%s300_s1 + $0x88] sm:$0xff] }
   0x3   :  { %79 = vmatpush.msra.mxu1 %v31_v2  ;;  %v12_v6 = vld [vmem:[%s300_s1] sm:$0xff] }
   0x4   :  { %67 = vmatpush.msra.mxu0 %v14_v1  ;;  %v49_v7 = vld [vmem:[%s299_s0] sm:$0xff] }
   0x5   :  { %80 = vmatpush.msra.mxu1 %v30_v4  ;;  %v28_v8 = vld [vmem:[%s300_s1 + $0x80] sm:$0xff] }
   0x6   :  { %68 = vmatpush.msra.mxu0 %v13_v3 }
   0x7   :  { %81 = vmatpush.msra.mxu1 %v29_v5 }
   0x8   :  { %7 = vsyncpa [#allocation3], 0  ;;  %69 = vmatpush.msra.mxu0 %v12_v6  ;;  %v27_v9 = vld [vmem:[%s300_s1 + $0x78] sm:$0xff]  ;;  %v26_v10 = vld [vmem:[%s300_s1 + $0x70] sm:$0xff]  ;;  %s166_s27 = smov [#allocation2]   ;;  %s129_s0 = sshll.u32 %s301_s2, 4  ;;  %s130_s0 = int_to_ptr.hbm [resolvable:$true] %s129_s0 }
   0x9   :  { %138 = vmatmul.msk.f32.vlgmr.msra.gmra.mxu0 %vm50_vm0, %v49_v7  ;;  %82 = vmatpush.msra.mxu1 %v28_v8  ;;  %v25_v11 = vld [vmem:[%s300_s1 + $0x68] sm:$0xff]  ;;  %v24_v12 = vld [vmem:[%s300_s1 + $0x60] sm:$0xff]  ;;  %v23_v13 = vld [vmem:[%s300_s1 + $0x58] sm:$0xff]  ;;  %s127_s28 = sshll.u32 %s166_s27, 4  ;;  %s128_s28 = int_to_ptr.vmem [resolvable:$true] %s127_s28 }
   0xa   :  { %v22_v14 = vld [vmem:[%s300_s1 + $0x50] sm:$0xff]  ;;  %v21_v15 = vld [vmem:[%s300_s1 + $0x48] sm:$0xff]  ;;  %v20_v16 = vld [vmem:[%s300_s1 + $0x40] sm:$0xff] }
   0xb   :  { %83 = vmatpush.msra.mxu1 %v27_v9  ;;  %v19_v17 = vld [vmem:[%s300_s1 + $0x38] sm:$0xff]  ;;  %v18_v18 = vld [vmem:[%s300_s1 + $0x30] sm:$0xff]  ;;  %v17_v19 = vld [vmem:[%s300_s1 + $0x28] sm:$0xff] }
   0xc   :  { %v16_v20 = vld [vmem:[%s300_s1 + $0x20] sm:$0xff]  ;;  %v47_v21 = vld [vmem:[%s300_s1 + $0x118] sm:$0xff]  ;;  %v46_v22 = vld [vmem:[%s300_s1 + $0x110] sm:$0xff] }
   0xd   :  { %84 = vmatpush.msra.mxu1 %v26_v10  ;;  %101 = vmatpush.msra.mxu2 %v47_v21  ;;  %v45_v23 = vld [vmem:[%s300_s1 + $0x108] sm:$0xff]  ;;  %v44_v24 = vld [vmem:[%s300_s1 + $0x100] sm:$0xff]  ;;  %v43_v25 = vld [vmem:[%s300_s1 + $0xf8] sm:$0xff] }
   0xe   :  { %v42_v26 = vld [vmem:[%s300_s1 + $0xf0] sm:$0xff]  ;;  %v41_v27 = vld [vmem:[%s300_s1 + $0xe8] sm:$0xff]  ;;  %v40_v28 = vld [vmem:[%s300_s1 + $0xe0] sm:$0xff] }
   0xf   :  { %85 = vmatpush.msra.mxu1 %v25_v11  ;;  %102 = vmatpush.msra.mxu2 %v46_v22  ;;  %v39_v29 = vld [vmem:[%s300_s1 + $0xd8] sm:$0xff]  ;;  %v38_v30 = vld [vmem:[%s300_s1 + $0xd0] sm:$0xff]  ;;  %v37_v31 = vld [vmem:[%s300_s1 + $0xc8] sm:$0xff] }
  0x10   :  { %v36_v32 = vld [vmem:[%s300_s1 + $0xc0] sm:$0xff]  ;;  %v35_v33 = vld [vmem:[%s300_s1 + $0xb8] sm:$0xff]  ;;  %v34_v36 = vld [vmem:[%s300_s1 + $0xb0] sm:$0xff] }
  0x11   :  { %86 = vmatpush.msra.mxu1 %v24_v12  ;;  %103 = vmatpush.msra.mxu2 %v45_v23  ;;  %v33_v37 = vld [vmem:[%s300_s1 + $0xa8] sm:$0xff]  ;;  %v32_v38 = vld [vmem:[%s300_s1 + $0xa0] sm:$0xff] }
  0x12   :  { %v48_v39 = vld [vmem:[%s300_s1 + $0x120] sm:$0xff] }
  0x13   :  { %87 = vmatpush.msra.mxu1 %v23_v13  ;;  %104 = vmatpush.msra.mxu2 %v44_v24  ;;  %v75_v40 = vperm.slane %v48_v39, 0  ;;  %v77_v42 = vperm.slane %v48_v39, 1 }
  0x15   :  { %88 = vmatpush.msra.mxu1 %v22_v14  ;;  %105 = vmatpush.msra.mxu2 %v43_v25 }
  0x17   :  { %89 = vmatpush.msra.mxu1 %v21_v15  ;;  %106 = vmatpush.msra.mxu2 %v42_v26 }
  0x19   :  { %90 = vmatpush.msra.mxu1 %v20_v16  ;;  %107 = vmatpush.msra.mxu2 %v41_v27 }
  0x1b   :  { %91 = vmatpush.msra.mxu1 %v19_v17  ;;  %108 = vmatpush.msra.mxu2 %v40_v28 }
  0x1d   :  { %92 = vmatpush.msra.mxu1 %v18_v18  ;;  %109 = vmatpush.msra.mxu2 %v39_v29 }
  0x1f   :  { %93 = vmatpush.msra.mxu1 %v17_v19  ;;  %110 = vmatpush.msra.mxu2 %v38_v30 }
  0x21   :  { %94 = vmatpush.msra.mxu1 %v16_v20  ;;  %111 = vmatpush.msra.mxu2 %v37_v31 }
  0x23   :  { %112 = vmatpush.msra.mxu2 %v36_v32 }
  0x25   :  { %113 = vmatpush.msra.mxu2 %v35_v33 }
  0x27   :  { %114 = vmatpush.msra.mxu2 %v34_v36 }
  0x29   :  { %115 = vmatpush.msra.mxu2 %v33_v37 }
  0x2b   :  { %116 = vmatpush.msra.mxu2 %v32_v38 }
  0x86   :  { %v71_v34 = vpop.f32.mrf.mxu0 }
  0x87   :  { %v74_v35 = vmax.f32 %v71_v34, 0.0 }
  0x89   :  { %95 = vmatmul.f32.vlgmr.msra.gmra.mxu1 %v74_v35  ;;  %v76_v41 = vmul.f32 %v75_v40, %v74_v35 }
  0x8b   :  { %v78_v45 = vadd.f32 %v77_v42, %v76_v41 }
 0x106   :  { %v96_v43 = vpop.f32.mrf.mxu1 }
 0x107   :  { %v99_v44 = vmax.f32 %v96_v43, 0.0 }
 0x109   :  { %v100_v46 = vadd.f32 %v99_v44, %v78_v45 }
 0x10b   :  { %117 = vmatmul.f32.vlgmr.msra.gmra.mxu2 %v100_v46 }
 0x18e   :  { %v118_v47 = vpop.f32.mrf.mxu2 }
 0x18f   :  { %121 = vst [vmem:[#allocation2] sm:$0xff] %v118_v47 }
 0x190   :  { %132 = dma.vmem_to_hbm [thread:$0]  %s128_s28, 128, %s130_s0, [#allocation3]  }
 0x191   :  { %164 = dma.done.wait [#allocation3], 128  }
 0x192   :  { %165 = vsyncadd [#allocation3], 4294967168 }
 0x193   :  { %137 = vsyncpa [#allocation3], 1 }

</bundles_post_ra>
